<compile_context>
chip_gen: v5e
topology: v5e:2x2
jax: 0.10.0
libtpu: 0.0.40
codegen_flags: <defaults>
</compile_context>

<pallas_src>
import functools

import jax
import jax.numpy as jnp
from jax.experimental import pallas as pl
from jax.experimental.pallas import tpu as pltpu

_LANE = 128  # TPU lane width


def _mlp_kernel(z_ref, w1_ref, b1_ref, w2_ref, b2_ref, w3_ref, b3_ref, o_ref):
    # Fused 3-layer MLP: bf16 matmuls on the MXU with f32 accumulation,
    # bias + ReLU on the VPU in f32. Whole batch-tile + all weights resident in VMEM.
    x = z_ref[...]                                                        # bf16 [bm, Z]
    h1 = jnp.dot(x, w1_ref[...], preferred_element_type=jnp.float32) + b1_ref[...]
    h1 = jnp.maximum(h1, 0.0).astype(jnp.bfloat16)
    h2 = jnp.dot(h1, w2_ref[...], preferred_element_type=jnp.float32) + b2_ref[...]
    h2 = jnp.maximum(h2, 0.0).astype(jnp.bfloat16)
    o = jnp.dot(h2, w3_ref[...], preferred_element_type=jnp.float32) + b3_ref[...]
    o_ref[...] = o.astype(o_ref.dtype)                                    # lane-dense store


def _pick_block_b(batch):
    """MXU-aligned batch tile; prefer >=2 grid tiles (v7x megacore) when batch allows."""
    b8 = -(-batch // 8) * 8
    if b8 <= 8:
        return 8
    for cand in (512, 256, 128, 64, 32, 16, 8):
        if b8 >= 2 * cand:
            return cand
    return 8


@functools.partial(jax.jit, static_argnames=("z_slice",))
def value_decoder_forward(z, params, z_slice):
    """z: [B, z_size] float32. Returns [B, out_dim] float32."""
    z0, z1 = z_slice
    B, z_size = z.shape
    w1 = params["w1"]
    b1 = params["b1"].reshape(1, -1)
    w2 = params["w2"]
    b2 = params["b2"].reshape(1, -1)
    w3 = params["w3"]
    b3 = params["b3"].reshape(1, -1)

    in_dim = z1 - z0
    assert w1.shape[0] == in_dim
    h1 = w1.shape[1]
    h2 = w2.shape[1]
    out_dim = w3.shape[1]

    # (1) Fold the feature slice into a zero-padded W1 -> feed the full z.
    w1_full = jnp.zeros((z_size, h1), w1.dtype).at[z0:z1, :].set(w1)

    # (2) Lane-dense final layer: pad N to a multiple of 128 (zeros).
    n_pad = max(_LANE, -(-out_dim // _LANE) * _LANE)
    w3_p = jnp.zeros((h2, n_pad), w3.dtype).at[:, :out_dim].set(w3)
    b3_p = jnp.zeros((1, n_pad), jnp.float32).at[:, :out_dim].set(b3.astype(jnp.float32))

    # (3) bf16 matmul operands; f32 biases.
    z_bf = z.astype(jnp.bfloat16)
    w1_bf = w1_full.astype(jnp.bfloat16)
    w2_bf = w2.astype(jnp.bfloat16)
    w3_bf = w3_p.astype(jnp.bfloat16)
    b1_f = b1.astype(jnp.float32)
    b2_f = b2.astype(jnp.float32)

    # (4) Batch tiling with tail padding (no divisibility requirement on callers).
    block_b = _pick_block_b(B)
    b_padded = -(-B // block_b) * block_b
    if b_padded != B:
        z_bf = jnp.pad(z_bf, ((0, b_padded - B), (0, 0)))

    grid = (b_padded // block_b,)

    # Weights/biases are grid-invariant (index_map constant) -> fetched once, kept in VMEM.
    in_specs = [
        pl.BlockSpec((block_b, z_size), lambda i: (i, 0)),   # z (full width, slice folded in)
        pl.BlockSpec((z_size, h1), lambda i: (0, 0)),        # w1 (zero-padded rows)
        pl.BlockSpec((1, h1), lambda i: (0, 0)),             # b1
        pl.BlockSpec((h1, h2), lambda i: (0, 0)),            # w2
        pl.BlockSpec((1, h2), lambda i: (0, 0)),             # b2
        pl.BlockSpec((h2, n_pad), lambda i: (0, 0)),         # w3 (lane-padded)
        pl.BlockSpec((1, n_pad), lambda i: (0, 0)),          # b3 (lane-padded)
    ]
    out_spec = pl.BlockSpec((block_b, n_pad), lambda i: (i, 0))

    out_padded = pl.pallas_call(
        _mlp_kernel,
        out_shape=jax.ShapeDtypeStruct((b_padded, n_pad), jnp.float32),
        grid_spec=pltpu.PrefetchScalarGridSpec(
            num_scalar_prefetch=0,
            grid=grid,
            in_specs=in_specs,
            out_specs=out_spec,
        ),
        compiler_params=pltpu.CompilerParams(
            dimension_semantics=("parallel",),
        ),
    )(z_bf, w1_bf, b1_f, w2_bf, b2_f, w3_bf, b3_p)

    # Wrapper-side un-pad (cheap slices).
    return out_padded[:B, :out_dim]


def init_params(key, in_dim, hidden1, hidden2, out_dim):
    """Deterministic synthetic init (PyTorch-like uniform fan-in scaling)."""
    ks = jax.random.split(key, 6)

    def lin(kw, kb, fan_in, fan_out):
        bound = 1.0 / jnp.sqrt(fan_in)
        w = jax.random.uniform(kw, (fan_in, fan_out), jnp.float32, -bound, bound)
        b = jax.random.uniform(kb, (1, fan_out), jnp.float32, -bound, bound)
        return w, b

    w1, b1 = lin(ks[0], ks[1], in_dim, hidden1)
    w2, b2 = lin(ks[2], ks[3], hidden1, hidden2)
    w3, b3 = lin(ks[4], ks[5], hidden2, out_dim)
    return {"w1": w1, "b1": b1, "w2": w2, "b2": b2, "w3": w3, "b3": b3}


def reference_forward(z, params, z_slice):
    """Pure-JAX f32 reference mirroring the PyTorch module."""
    z0, z1 = z_slice
    u = z[:, z0:z1]
    h1 = jnp.maximum(u @ params["w1"] + params["b1"], 0.0)
    h2 = jnp.maximum(h1 @ params["w2"] + params["b2"], 0.0)
    return h2 @ params["w3"] + params["b3"]


if __name__ == "__main__":
    # Config consistent with the module:
    #   cfg.z_size = 64, cfg.value_decoder.z_slice -> (16, 48)  => input_size = 32
    #   cfg.io_format.val_points (out_dim) = 16
    #   architecture = 'mlp-small' (hidden 256 -> 256)
    z_size = 64
    z_slice = (16, 48)
    input_size = z_slice[1] - z_slice[0]
    out_dim = 16
    hidden = 256

    key = jax.random.PRNGKey(0)
    kz, kz2, kp = jax.random.split(key, 3)
    params = init_params(kp, input_size, hidden, hidden, out_dim)

    # bf16 matmuls (f32 accumulation) -> compare to the f32 reference with a bf16-level tolerance.
    tol = 5e-2

    # Small batch (single grid tile).
    batch = 8
    z = jax.random.normal(kz, (batch, z_size), dtype=jnp.float32)
    out = jax.block_until_ready(value_decoder_forward(z, params, z_slice))
    ref = reference_forward(z, params, z_slice)
    assert out.shape == (batch, out_dim)
    assert float(jnp.max(jnp.abs(out - ref))) < tol, "mismatch vs pure-JAX reference (small batch)"

    # Larger ragged batch (exercises multi-tile grid + tail padding).
    batch2 = 260
    z2 = jax.random.normal(kz2, (batch2, z_size), dtype=jnp.float32)
    out2 = jax.block_until_ready(value_decoder_forward(z2, params, z_slice))
    ref2 = reference_forward(z2, params, z_slice)
    assert out2.shape == (batch2, out_dim)
    assert float(jnp.max(jnp.abs(out2 - ref2))) < tol, "mismatch vs pure-JAX reference (large batch)"

    print("KERNEL_OK")
</pallas_src>

<mosaic_0001>
module attributes {stable_mosaic.version = 11 : i64} {
  func.func @_mlp_kernel(%arg0: i32, %arg1: memref<8x64xbf16, #tpu.memory_space<vmem>>, %arg2: memref<64x256xbf16, #tpu.memory_space<vmem>>, %arg3: memref<1x256xf32, #tpu.memory_space<vmem>>, %arg4: memref<256x256xbf16, #tpu.memory_space<vmem>>, %arg5: memref<1x256xf32, #tpu.memory_space<vmem>>, %arg6: memref<256x128xbf16, #tpu.memory_space<vmem>>, %arg7: memref<1x128xf32, #tpu.memory_space<vmem>>, %arg8: memref<8x128xf32, #tpu.memory_space<vmem>>) attributes {dimension_semantics = [#tpu.dimension_semantics<parallel>], iteration_bounds = array<i64: 1>, scalar_prefetch = 0 : i64, scratch_operands = 0 : i64, tpu.core_type = #tpu.core_type<tc>, window_params = [{transform_indices = @transform_0, window_bounds = array<i64: 8, 64>}, {pipeline_mode = #tpu.pipeline_mode<synchronous>, transform_indices = @transform_1, window_bounds = array<i64: 64, 256>}, {pipeline_mode = #tpu.pipeline_mode<synchronous>, transform_indices = @transform_2, window_bounds = array<i64: 1, 256>}, {pipeline_mode = #tpu.pipeline_mode<synchronous>, transform_indices = @transform_3, window_bounds = array<i64: 256, 256>}, {pipeline_mode = #tpu.pipeline_mode<synchronous>, transform_indices = @transform_4, window_bounds = array<i64: 1, 256>}, {pipeline_mode = #tpu.pipeline_mode<synchronous>, transform_indices = @transform_5, window_bounds = array<i64: 256, 128>}, {pipeline_mode = #tpu.pipeline_mode<synchronous>, transform_indices = @transform_6, window_bounds = array<i64: 1, 128>}, {transform_indices = @transform_7, window_bounds = array<i64: 8, 128>}]} {
    %c0 = arith.constant 0 : index
    %c0_0 = arith.constant 0 : index
    %0 = vector.load %arg1[%c0, %c0_0] : memref<8x64xbf16, #tpu.memory_space<vmem>>, vector<8x64xbf16>
    %c0_1 = arith.constant 0 : index
    %c0_2 = arith.constant 0 : index
    %1 = vector.load %arg2[%c0_1, %c0_2] : memref<64x256xbf16, #tpu.memory_space<vmem>>, vector<64x256xbf16>
    %cst = arith.constant dense<0.000000e+00> : vector<8x256xf32>
    %2 = tpu.matmul %0, %1, %cst {dimension_numbers = #tpu.dot_dimension_numbers<[1], [0], [0], [1], [0, 0, 1, 1], [], []>} : vector<8x64xbf16>, vector<64x256xbf16>, vector<8x256xf32> -> vector<8x256xf32>
    %c0_3 = arith.constant 0 : index
    %c0_4 = arith.constant 0 : index
    %3 = vector.load %arg3[%c0_3, %c0_4] : memref<1x256xf32, #tpu.memory_space<vmem>>, vector<1x256xf32>
    %4 = vector.broadcast %3 : vector<1x256xf32> to vector<8x256xf32>
    %5 = arith.addf %2, %4 : vector<8x256xf32>
    %cst_5 = arith.constant 0.000000e+00 : f32
    %6 = vector.broadcast %cst_5 : f32 to vector<8x256xf32>
    %7 = arith.maximumf %5, %6 : vector<8x256xf32>
    %8 = arith.truncf %7 : vector<8x256xf32> to vector<8x256xbf16>
    %c0_6 = arith.constant 0 : index
    %c0_7 = arith.constant 0 : index
    %9 = vector.load %arg4[%c0_6, %c0_7] : memref<256x256xbf16, #tpu.memory_space<vmem>>, vector<256x256xbf16>
    %cst_8 = arith.constant dense<0.000000e+00> : vector<8x256xf32>
    %10 = tpu.matmul %8, %9, %cst_8 {dimension_numbers = #tpu.dot_dimension_numbers<[1], [0], [0], [1], [0, 0, 1, 1], [], []>} : vector<8x256xbf16>, vector<256x256xbf16>, vector<8x256xf32> -> vector<8x256xf32>
    %c0_9 = arith.constant 0 : index
    %c0_10 = arith.constant 0 : index
    %11 = vector.load %arg5[%c0_9, %c0_10] : memref<1x256xf32, #tpu.memory_space<vmem>>, vector<1x256xf32>
    %12 = vector.broadcast %11 : vector<1x256xf32> to vector<8x256xf32>
    %13 = arith.addf %10, %12 : vector<8x256xf32>
    %cst_11 = arith.constant 0.000000e+00 : f32
    %14 = vector.broadcast %cst_11 : f32 to vector<8x256xf32>
    %15 = arith.maximumf %13, %14 : vector<8x256xf32>
    %16 = arith.truncf %15 : vector<8x256xf32> to vector<8x256xbf16>
    %c0_12 = arith.constant 0 : index
    %c0_13 = arith.constant 0 : index
    %17 = vector.load %arg6[%c0_12, %c0_13] : memref<256x128xbf16, #tpu.memory_space<vmem>>, vector<256x128xbf16>
    %cst_14 = arith.constant dense<0.000000e+00> : vector<8x128xf32>
    %18 = tpu.matmul %16, %17, %cst_14 {dimension_numbers = #tpu.dot_dimension_numbers<[1], [0], [0], [1], [0, 0, 1, 1], [], []>} : vector<8x256xbf16>, vector<256x128xbf16>, vector<8x128xf32> -> vector<8x128xf32>
    %c0_15 = arith.constant 0 : index
    %c0_16 = arith.constant 0 : index
    %19 = vector.load %arg7[%c0_15, %c0_16] : memref<1x128xf32, #tpu.memory_space<vmem>>, vector<1x128xf32>
    %20 = vector.broadcast %19 : vector<1x128xf32> to vector<8x128xf32>
    %21 = arith.addf %18, %20 : vector<8x128xf32>
    %c0_17 = arith.constant 0 : index
    %c0_18 = arith.constant 0 : index
    %22 = vector.load %arg8[%c0_17, %c0_18] : memref<8x128xf32, #tpu.memory_space<vmem>>, vector<8x128xf32>
    tpu.vector_store %arg8[%c0_17, %c0_18], %21 {strides = array<i32>} : memref<8x128xf32, #tpu.memory_space<vmem>>, vector<8x128xf32>,
    return
  }
  func.func @transform_0(%arg0: i32) -> (i32, i32) {
    %c0_i32 = arith.constant 0 : i32
    %c0_i32_0 = arith.constant 0 : i32
    return %arg0, %c0_i32 : i32, i32
  }
  func.func @transform_1(%arg0: i32) -> (i32, i32) {
    %c0_i32 = arith.constant 0 : i32
    %c0_i32_0 = arith.constant 0 : i32
    %c0_i32_1 = arith.constant 0 : i32
    return %c0_i32, %c0_i32_0 : i32, i32
  }
  func.func @transform_2(%arg0: i32) -> (i32, i32) {
    %c0_i32 = arith.constant 0 : i32
    %c0_i32_0 = arith.constant 0 : i32
    %c0_i32_1 = arith.constant 0 : i32
    return %c0_i32, %c0_i32_0 : i32, i32
  }
  func.func @transform_3(%arg0: i32) -> (i32, i32) {
    %c0_i32 = arith.constant 0 : i32
    %c0_i32_0 = arith.constant 0 : i32
    %c0_i32_1 = arith.constant 0 : i32
    return %c0_i32, %c0_i32_0 : i32, i32
  }
  func.func @transform_4(%arg0: i32) -> (i32, i32) {
    %c0_i32 = arith.constant 0 : i32
    %c0_i32_0 = arith.constant 0 : i32
    %c0_i32_1 = arith.constant 0 : i32
    return %c0_i32, %c0_i32_0 : i32, i32
  }
  func.func @transform_5(%arg0: i32) -> (i32, i32) {
    %c0_i32 = arith.constant 0 : i32
    %c0_i32_0 = arith.constant 0 : i32
    %c0_i32_1 = arith.constant 0 : i32
    return %c0_i32, %c0_i32_0 : i32, i32
  }
  func.func @transform_6(%arg0: i32) -> (i32, i32) {
    %c0_i32 = arith.constant 0 : i32
    %c0_i32_0 = arith.constant 0 : i32
    %c0_i32_1 = arith.constant 0 : i32
    return %c0_i32, %c0_i32_0 : i32, i32
  }
  func.func @transform_7(%arg0: i32) -> (i32, i32) {
    %c0_i32 = arith.constant 0 : i32
    %c0_i32_0 = arith.constant 0 : i32
    return %arg0, %c0_i32 : i32, i32
  }
}

</mosaic_0001>

<bundles_post_ra>
// kernel: value_decoder_forward.1
= control target key start
LH: loop header
LB: loop body
LE: loop exit
PB: predicated region body
PF: predicated region fallthrough
CT: control target
= control target key end

     0   :  { %vm83_vm0 = vcmask 523264   ;;  %s1202_s0 = inlined_call_operand.vmem [shape: bf16[8,64], index: 0, kind: input, shape index: {}]   ;;  %s1203_s1 = inlined_call_operand.vmem [shape: bf16[64,256], index: 1, kind: input, shape index: {}]   ;;  %s1204_s2 = inlined_call_operand.vmem [shape: f32[1,256], index: 2, kind: input, shape index: {}]   ;;  %s1205_s3 = inlined_call_operand.vmem [shape: bf16[256,256], index: 3, kind: input, shape index: {}]   ;;  %s1206_s4 = inlined_call_operand.vmem [shape: f32[1,256], index: 4, kind: input, shape index: {}]   ;;  %s1207_s5 = inlined_call_operand.vmem [shape: bf16[256,128], index: 5, kind: input, shape index: {}]   ;;  %s1208_s6 = inlined_call_operand.vmem [shape: f32[1,128], index: 6, kind: input, shape index: {}]   ;;  %s1209_s7 = inlined_call_operand.hbm [shape: f32[8,128], index: 7, kind: output, shape index: {}]  }
   0x1   :  { %v572_v0 = vld [vmem:[%s1203_s1 + $0x30] sm:$0xf]  ;;  %v779_v1 = vld [vmem:[%s1203_s1 + $0x34] sm:$0xf0]  ;;  %v778_v2 = vld [vmem:[%s1203_s1 + $0x34] sm:$0xf] }
   0x2   :  { %v573_v3 = vor.u32 %v779_v1, %v572_v0  ;;  %v574_v4 = vld [vmem:[%s1203_s1 + $0x38] sm:$0xf0]  ;;  %v564_v5 = vld [vmem:[%s1203_s1 + $0x20] sm:$0xf]  ;;  %v777_v6 = vld [vmem:[%s1203_s1 + $0x24] sm:$0xf0] }
   0x3   :  { %v577_v7 = vor.u32 %v778_v2, %v574_v4  ;;  %v776_v8 = vld [vmem:[%s1203_s1 + $0x24] sm:$0xf]  ;;  %v566_v9 = vld [vmem:[%s1203_s1 + $0x28] sm:$0xf0]  ;;  %v565_v10 = vor.u32 %v777_v6, %v564_v5  ;;  %v556_v12 = vld [vmem:[%s1203_s1 + $0x10] sm:$0xf] }
   0x4   :  { %91 = vmatpush.bf16.msra.mxu0 %v573_v3  ;;  %v569_v11 = vor.u32 %v776_v8, %v566_v9  ;;  %v775_v13 = vld [vmem:[%s1203_s1 + $0x14] sm:$0xf0]  ;;  %v774_v14 = vld [vmem:[%s1203_s1 + $0x14] sm:$0xf]  ;;  %v558_v15 = vld [vmem:[%s1203_s1 + $0x18] sm:$0xf0] }
   0x5   :  { %104 = vmatpush.bf16.msra.mxu1 %v577_v7  ;;  %v548_v16 = vld [vmem:[%s1203_s1] sm:$0xf]  ;;  %v773_v17 = vld [vmem:[%s1203_s1 + $0x4] sm:$0xf0]  ;;  %v638_v18 = vld [vmem:[%s1205_s3 + $0x70] sm:$0xf]  ;;  %v557_v21 = vor.u32 %v775_v13, %v556_v12  ;;  %v561_v26 = vor.u32 %v774_v14, %v558_v15 }
   0x6   :  { %v795_v19 = vld [vmem:[%s1205_s3 + $0x74] sm:$0xf0]  ;;  %v702_v20 = vld [vmem:[%s1205_s3 + $0xf0] sm:$0xf]  ;;  %v772_v22 = vld [vmem:[%s1203_s1 + $0x4] sm:$0xf]  ;;  %v549_v38 = vor.u32 %v773_v17, %v548_v16 }
   0x7   :  { %v550_v23 = vld [vmem:[%s1203_s1 + $0x8] sm:$0xf0]  ;;  %v639_v24 = vor.u32 %v795_v19, %v638_v18  ;;  %v811_v25 = vld [vmem:[%s1205_s3 + $0xf4] sm:$0xf0]  ;;  %v794_v28 = vld [vmem:[%s1205_s3 + $0x74] sm:$0xf] }
   0x8   :  { %92 = vmatpush.bf16.msra.mxu0 %v565_v10  ;;  %v703_v27 = vor.u32 %v811_v25, %v702_v20  ;;  %v640_v29 = vld [vmem:[%s1205_s3 + $0x78] sm:$0xf0]  ;;  %v630_v30 = vld [vmem:[%s1205_s3 + $0x60] sm:$0xf]  ;;  %v793_v31 = vld [vmem:[%s1205_s3 + $0x64] sm:$0xf0]  ;;  %v553_v41 = vor.u32 %v772_v22, %v550_v23 }
   0x9   :  { %105 = vmatpush.bf16.msra.mxu1 %v569_v11  ;;  %315 = vmatpush.bf16.msra.mxu2 %v639_v24  ;;  %v694_v32 = vld [vmem:[%s1205_s3 + $0xe0] sm:$0xf]  ;;  %v809_v33 = vld [vmem:[%s1205_s3 + $0xe4] sm:$0xf0]  ;;  %v810_v34 = vld [vmem:[%s1205_s3 + $0xf4] sm:$0xf]  ;;  %v631_v36 = vor.u32 %v793_v31, %v630_v30  ;;  %v643_v42 = vor.u32 %v794_v28, %v640_v29 }
   0xa   :  { %328 = vmatpush.bf16.msra.mxu3 %v703_v27  ;;  %v704_v35 = vld [vmem:[%s1205_s3 + $0xf8] sm:$0xf0]  ;;  %v695_v37 = vor.u32 %v809_v33, %v694_v32  ;;  %v622_v39 = vld [vmem:[%s1205_s3 + $0x50] sm:$0xf]  ;;  %v791_v40 = vld [vmem:[%s1205_s3 + $0x54] sm:$0xf0] }
   0xb   :  { %v686_v43 = vld [vmem:[%s1205_s3 + $0xd0] sm:$0xf]  ;;  %v807_v44 = vld [vmem:[%s1205_s3 + $0xd4] sm:$0xf0]  ;;  %v28_v45 = vld [vmem:[%s1202_s0] sm:$0xf]  ;;  %v707_v46 = vor.u32 %v810_v34, %v704_v35  ;;  %v623_v50 = vor.u32 %v791_v40, %v622_v39 }
   0xc   :  { %93 = vmatpush.bf16.msra.mxu0 %v557_v21  ;;  %v792_v47 = vld [vmem:[%s1205_s3 + $0x64] sm:$0xf]  ;;  %v632_v48 = vld [vmem:[%s1205_s3 + $0x68] sm:$0xf0]  ;;  %v687_v52 = vor.u32 %v807_v44, %v686_v43  ;;  %v614_v53 = vld [vmem:[%s1205_s3 + $0x40] sm:$0xf] }
   0xd   :  { %106 = vmatpush.bf16.msra.mxu1 %v561_v26  ;;  %316 = vmatpush.bf16.msra.mxu2 %v631_v36  ;;  %v808_v49 = vld [vmem:[%s1205_s3 + $0xe4] sm:$0xf]  ;;  %v696_v51 = vld [vmem:[%s1205_s3 + $0xe8] sm:$0xf0]  ;;  %v789_v54 = vld [vmem:[%s1205_s3 + $0x44] sm:$0xf0]  ;;  %v635_v57 = vor.u32 %v792_v47, %v632_v48 }
   0xe   :  { %329 = vmatpush.bf16.msra.mxu3 %v695_v37  ;;  %v678_v55 = vld [vmem:[%s1205_s3 + $0xc0] sm:$0xf]  ;;  %v805_v56 = vld [vmem:[%s1205_s3 + $0xc4] sm:$0xf0]  ;;  %v699_v58 = vor.u32 %v808_v49, %v696_v51  ;;  %v790_v59 = vld [vmem:[%s1205_s3 + $0x54] sm:$0xf]  ;;  %v615_v62 = vor.u32 %v789_v54, %v614_v53 }
   0xf   :  { %v624_v60 = vld [vmem:[%s1205_s3 + $0x58] sm:$0xf0]  ;;  %v806_v61 = vld [vmem:[%s1205_s3 + $0xd4] sm:$0xf]  ;;  %v679_v0 = vor.u32 %v805_v56, %v678_v55  ;;  %v606_v1 = vld [vmem:[%s1205_s3 + $0x30] sm:$0xf] }
  0x10   :  { %94 = vmatpush.bf16.msra.mxu0 %v549_v38  ;;  %v688_v63 = vld [vmem:[%s1205_s3 + $0xd8] sm:$0xf0]  ;;  %v787_v2 = vld [vmem:[%s1205_s3 + $0x34] sm:$0xf0]  ;;  %v670_v3 = vld [vmem:[%s1205_s3 + $0xb0] sm:$0xf]  ;;  %v627_v5 = vor.u32 %v790_v59, %v624_v60 }
  0x11   :  { %107 = vmatpush.bf16.msra.mxu1 %v553_v41  ;;  %317 = vmatpush.bf16.msra.mxu2 %v623_v50  ;;  %v803_v4 = vld [vmem:[%s1205_s3 + $0xb4] sm:$0xf0]  ;;  %v788_v6 = vld [vmem:[%s1205_s3 + $0x44] sm:$0xf]  ;;  %v616_v7 = vld [vmem:[%s1205_s3 + $0x48] sm:$0xf0]  ;;  %v691_v8 = vor.u32 %v806_v61, %v688_v63  ;;  %v607_v11 = vor.u32 %v787_v2, %v606_v1 }
  0x12   :  { %330 = vmatpush.bf16.msra.mxu3 %v687_v52  ;;  %v804_v9 = vld [vmem:[%s1205_s3 + $0xc4] sm:$0xf]  ;;  %v680_v10 = vld [vmem:[%s1205_s3 + $0xc8] sm:$0xf0]  ;;  %v598_v12 = vld [vmem:[%s1205_s3 + $0x20] sm:$0xf]  ;;  %v671_v13 = vor.u32 %v803_v4, %v670_v3 }
  0x13   :  { %578 = vmatmul.msk.bf16.vlgmr.msra.gmra.mxu0 %vm83_vm0, %v28_v45  ;;  %v785_v14 = vld [vmem:[%s1205_s3 + $0x24] sm:$0xf0] }
  0x14   :  { %341 = vmatpush.bf16.msrb.mxu0 %v643_v42  ;;  %579 = vmatmul.msk.bf16.vlgmr.msra.gmra.mxu1 %vm83_vm0, %v28_v45 }
  0x15   :  { %354 = vmatpush.bf16.msrb.mxu1 %v707_v46  ;;  %318 = vmatpush.bf16.msra.mxu2 %v615_v62 }
  0x16   :  { %331 = vmatpush.bf16.msra.mxu3 %v679_v0 }
  0x18   :  { %342 = vmatpush.bf16.msrb.mxu0 %v635_v57 }
  0x19   :  { %355 = vmatpush.bf16.msrb.mxu1 %v699_v58 }
  0x1a   :  { %12 = vsyncpa [#allocation3], 0  ;;  %v662_v15 = vld [vmem:[%s1205_s3 + $0xa0] sm:$0xf]  ;;  %v801_v16 = vld [vmem:[%s1205_s3 + $0xa4] sm:$0xf0]  ;;  %v619_v17 = vor.u32 %v788_v6, %v616_v7  ;;  %v683_v18 = vor.u32 %v804_v9, %v680_v10  ;;  %319 = vmatpush.bf16.msra.mxu2 %v607_v11  ;;  %v599_v21 = vor.u32 %v785_v14, %v598_v12  ;;  %332 = vmatpush.bf16.msra.mxu3 %v671_v13 }
  0x1b   :  { %v786_v19 = vld [vmem:[%s1205_s3 + $0x34] sm:$0xf]  ;;  %v608_v20 = vld [vmem:[%s1205_s3 + $0x38] sm:$0xf0]  ;;  %v663_v24 = vor.u32 %v801_v16, %v662_v15  ;;  %v784_v27 = vld [vmem:[%s1205_s3 + $0x24] sm:$0xf] }
  0x1c   :  { %343 = vmatpush.bf16.msrb.mxu0 %v627_v5  ;;  %v802_v22 = vld [vmem:[%s1205_s3 + $0xb4] sm:$0xf]  ;;  %v672_v23 = vld [vmem:[%s1205_s3 + $0xb8] sm:$0xf0]  ;;  %v611_v25 = vor.u32 %v786_v19, %v608_v20  ;;  %v600_v28 = vld [vmem:[%s1205_s3 + $0x28] sm:$0xf0] }
  0x1d   :  { %356 = vmatpush.bf16.msrb.mxu1 %v691_v8  ;;  %v675_v26 = vor.u32 %v802_v22, %v672_v23  ;;  %v800_v29 = vld [vmem:[%s1205_s3 + $0xa4] sm:$0xf]  ;;  %v664_v30 = vld [vmem:[%s1205_s3 + $0xa8] sm:$0xf0]  ;;  %v603_v31 = vor.u32 %v784_v27, %v600_v28  ;;  %v590_v33 = vld [vmem:[%s1205_s3 + $0x10] sm:$0xf] }
  0x1e   :  { %320 = vmatpush.bf16.msra.mxu2 %v599_v21  ;;  %333 = vmatpush.bf16.msra.mxu3 %v663_v24  ;;  %v667_v32 = vor.u32 %v800_v29, %v664_v30  ;;  %v783_v34 = vld [vmem:[%s1205_s3 + $0x14] sm:$0xf0]  ;;  %v654_v35 = vld [vmem:[%s1205_s3 + $0x90] sm:$0xf]  ;;  %v782_v38 = vld [vmem:[%s1205_s3 + $0x14] sm:$0xf] }
  0x1f   :  { %v591_v36 = vor.u32 %v783_v34, %v590_v33  ;;  %v799_v37 = vld [vmem:[%s1205_s3 + $0x94] sm:$0xf0]  ;;  %v592_v39 = vld [vmem:[%s1205_s3 + $0x18] sm:$0xf0]  ;;  %v798_v42 = vld [vmem:[%s1205_s3 + $0x94] sm:$0xf] }
  0x20   :  { %344 = vmatpush.bf16.msrb.mxu0 %v619_v17  ;;  %v655_v40 = vor.u32 %v799_v37, %v654_v35  ;;  %v595_v41 = vor.u32 %v782_v38, %v592_v39  ;;  %v656_v43 = vld [vmem:[%s1205_s3 + $0x98] sm:$0xf0]  ;;  %v582_v45 = vld [vmem:[%s1205_s3] sm:$0xf]  ;;  %v781_v46 = vld [vmem:[%s1205_s3 + $0x4] sm:$0xf0] }
  0x21   :  { %357 = vmatpush.bf16.msrb.mxu1 %v683_v18  ;;  %v659_v44 = vor.u32 %v798_v42, %v656_v43  ;;  %v646_v47 = vld [vmem:[%s1205_s3 + $0x80] sm:$0xf]  ;;  %v583_v48 = vor.u32 %v781_v46, %v582_v45  ;;  %v797_v49 = vld [vmem:[%s1205_s3 + $0x84] sm:$0xf0]  ;;  %v780_v50 = vld [vmem:[%s1205_s3 + $0x4] sm:$0xf] }
  0x22   :  { %321 = vmatpush.bf16.msra.mxu2 %v591_v36  ;;  %334 = vmatpush.bf16.msra.mxu3 %v655_v40  ;;  %v584_v51 = vld [vmem:[%s1205_s3 + $0x8] sm:$0xf0]  ;;  %v647_v52 = vor.u32 %v797_v49, %v646_v47  ;;  %v796_v54 = vld [vmem:[%s1205_s3 + $0x84] sm:$0xf]  ;;  %v827_v57 = vld [vmem:[%s1207_s5 + $0x78] sm:$0xff]  ;;  %s856_s1 = smov [#allocation2]  }
  0x23   :  { %v587_v53 = vor.u32 %v780_v50, %v584_v51  ;;  %v648_v55 = vld [vmem:[%s1205_s3 + $0x88] sm:$0xf0]  ;;  %v819_v58 = vld [vmem:[%s1207_s5 + $0x38] sm:$0xff]  ;;  %v826_v59 = vld [vmem:[%s1207_s5 + $0x70] sm:$0xff]  ;;  %s535_s24 = sshll.u32 %s856_s1, 4  ;;  %s537_s0 = sshll.u32 %s1209_s7, 4  ;;  %s536_s24 = int_to_ptr.vmem [resolvable:$true] %s535_s24  ;;  %s538_s0 = int_to_ptr.hbm [resolvable:$true] %s537_s0 }
  0x24   :  { %345 = vmatpush.bf16.msrb.mxu0 %v611_v25  ;;  %v651_v56 = vor.u32 %v796_v54, %v648_v55  ;;  %v818_v60 = vld [vmem:[%s1207_s5 + $0x30] sm:$0xff]  ;;  %v825_v61 = vld [vmem:[%s1207_s5 + $0x68] sm:$0xff]  ;;  %v824_v63 = vld [vmem:[%s1207_s5 + $0x60] sm:$0xff] }
  0x25   :  { %358 = vmatpush.bf16.msrb.mxu1 %v675_v26  ;;  %v817_v62 = vld [vmem:[%s1207_s5 + $0x28] sm:$0xff]  ;;  %v816_v0 = vld [vmem:[%s1207_s5 + $0x20] sm:$0xff]  ;;  %v823_v1 = vld [vmem:[%s1207_s5 + $0x58] sm:$0xff] }
  0x26   :  { %322 = vmatpush.bf16.msra.mxu2 %v583_v48  ;;  %335 = vmatpush.bf16.msra.mxu3 %v647_v52  ;;  %v37_v2 = vld [vmem:[%s1204_s2] sm:$0x3]  ;;  %v822_v3 = vld [vmem:[%s1207_s5 + $0x50] sm:$0xff]  ;;  %v815_v16 = vld [vmem:[%s1207_s5 + $0x18] sm:$0xff] }
  0x27   :  { %v39_v4 = vperm.slane %v37_v2, 0  ;;  %v40_v5 = vperm.slane %v37_v2, 1  ;;  %v821_v17 = vld [vmem:[%s1207_s5 + $0x48] sm:$0xff]  ;;  %v814_v18 = vld [vmem:[%s1207_s5 + $0x10] sm:$0xff]  ;;  %v820_v19 = vld [vmem:[%s1207_s5 + $0x40] sm:$0xff] }
  0x28   :  { %346 = vmatpush.bf16.msrb.mxu0 %v603_v31  ;;  %v813_v20 = vld [vmem:[%s1207_s5 + $0x8] sm:$0xff]  ;;  %v812_v21 = vld [vmem:[%s1207_s5] sm:$0xff] }
  0x29   :  { %359 = vmatpush.bf16.msrb.mxu1 %v667_v32  ;;  %v149_v22 = vld [vmem:[%s1206_s4] sm:$0x3] }
  0x2a   :  { %516 = vmatpush.bf16.msrb.mxu3 %v827_v57  ;;  %503 = vmatpush.bf16.msrb.mxu2 %v819_v58  ;;  %v152_v23 = vperm.slane %v149_v22, 1  ;;  %v151_v28 = vperm.slane %v149_v22, 0  ;;  %v829_v42 = vld [vmem:[%s1208_s6] ss:$0 sm:$0xff] }
  0x2c   :  { %347 = vmatpush.bf16.msrb.mxu0 %v595_v41 }
  0x2d   :  { %360 = vmatpush.bf16.msrb.mxu1 %v659_v44 }
  0x2e   :  { %517 = vmatpush.bf16.msrb.mxu3 %v826_v59  ;;  %504 = vmatpush.bf16.msrb.mxu2 %v818_v60 }
  0x30   :  { %348 = vmatpush.bf16.msrb.mxu0 %v587_v53 }
  0x31   :  { %361 = vmatpush.bf16.msrb.mxu1 %v651_v56 }
  0x32   :  { %518 = vmatpush.bf16.msrb.mxu3 %v825_v61  ;;  %505 = vmatpush.bf16.msrb.mxu2 %v817_v62 }
  0x36   :  { %519 = vmatpush.bf16.msrb.mxu3 %v824_v63  ;;  %506 = vmatpush.bf16.msrb.mxu2 %v816_v0 }
  0x3a   :  { %520 = vmatpush.bf16.msrb.mxu3 %v823_v1  ;;  %507 = vmatpush.bf16.msrb.mxu2 %v815_v16 }
  0x3e   :  { %521 = vmatpush.bf16.msrb.mxu3 %v822_v3  ;;  %508 = vmatpush.bf16.msrb.mxu2 %v814_v18 }
  0x42   :  { %522 = vmatpush.bf16.msrb.mxu3 %v821_v17  ;;  %509 = vmatpush.bf16.msrb.mxu2 %v813_v20 }
  0x46   :  { %523 = vmatpush.bf16.msrb.mxu3 %v820_v19  ;;  %510 = vmatpush.bf16.msrb.mxu2 %v812_v21 }
  0x90   :  { %v96_v6 = vpop.f32.mrf.mxu0 }
  0x91   :  { %v97_v7 = vadd.f32 %v96_v6, %v39_v4  ;;  %v109_v8 = vpop.f32.mrf.mxu1 }
  0x92   :  { %v110_v9 = vadd.f32 %v109_v8, %v40_v5 }
  0x93   :  { %v113_v10 = vmax.f32 %v97_v7, 0.0 }
  0x94   :  { %v114_v11 = vmax.f32 %v110_v9, 0.0 }
  0x95   :  { %v115_v12 = vpack.c.bf16 %v113_v10, %v113_v10 }
  0x96   :  { %v116_v13 = vpack.c.bf16 %v114_v11, %v114_v11 }
  0x97   :  { %323 = vmatmul.bf16.vlgmr.msra.gmra.mxu2 %v115_v12  ;;  %349 = vmatmul.bf16.vlgmr.msrb.gmra.mxu0 %v115_v12 }
  0x98   :  { %336 = vmatmul.bf16.vlgmr.msra.gmra.mxu3 %v116_v13  ;;  %362 = vmatmul.bf16.vlgmr.msrb.gmra.mxu1 %v116_v13  ;;  %v98_v14 = vpop.f32.mrf.mxu0 }
  0x99   :  { %v111_v15 = vpop.f32.mrf.mxu1 }
 0x114   :  { %v350_v24 = vpop.f32.mrf.mxu0 }
 0x115   :  { %v351_v25 = vadd.f32 %v350_v24, %v152_v23  ;;  %v363_v26 = vpop.f32.mrf.mxu1 }
 0x117   :  { %v364_v27 = vadd.f32 %v363_v26, %v351_v25 }
 0x119   :  { %v368_v29 = vmax.f32 %v364_v27, 0.0 }
 0x11a   :  { %v324_v30 = vpop.f32.mrf.mxu2 }
 0x11b   :  { %v370_v31 = vpack.c.bf16 %v368_v29, %v368_v29  ;;  %v325_v32 = vadd.f32 %v324_v30, %v151_v28  ;;  %v337_v33 = vpop.f32.mrf.mxu3 }
 0x11c   :  { %v352_v34 = vpop.f32.mrf.mxu0 }
 0x11d   :  { %v338_v35 = vadd.f32 %v337_v33, %v325_v32  ;;  %v365_v36 = vpop.f32.mrf.mxu1  ;;  %524 = vmatmul.bf16.vlgmr.msrb.gmra.mxu3 %v370_v31 }
 0x11f   :  { %v367_v37 = vmax.f32 %v338_v35, 0.0 }
 0x121   :  { %v369_v38 = vpack.c.bf16 %v367_v37, %v367_v37 }
 0x122   :  { %v326_v39 = vpop.f32.mrf.mxu2 }
 0x123   :  { %v339_v40 = vpop.f32.mrf.mxu3  ;;  %511 = vmatmul.bf16.vlgmr.msrb.gmra.mxu2 %v369_v38 }
 0x1a0   :  { %v525_v41 = vpop.f32.mrf.mxu3 }
 0x1a6   :  { %v512_v43 = vpop.f32.mrf.mxu2 }
 0x1a7   :  { %v513_v44 = vadd.f32 %v829_v42, %v512_v43 }
 0x1a8   :  { %v527_v45 = vpop.f32.mrf.mxu3 }
 0x1a9   :  { %v526_v46 = vadd.f32 %v525_v41, %v513_v44 }
 0x1ab   :  { %529 = vst [vmem:[#allocation2] sm:$0xff] %v526_v46 }
 0x1ac   :  { %540 = dma.vmem_to_hbm [thread:$0]  %s536_s24, 128, %s538_s0, [#allocation3]  }
 0x1ae   :  { %v514_v47 = vpop.f32.mrf.mxu2 }
 0x1af   :  { %854 = dma.done.wait [#allocation3], 128  }
 0x1b0   :  { %855 = vsyncadd [#allocation3], 4294967168 }
 0x1b1   :  { %545 = vsyncpa [#allocation3], 1 }

</bundles_post_ra>
